<compile_context>
chip_gen: v6e
topology: v6e:2x2x1
jax: 0.10.0
libtpu: 0.0.40
codegen_flags: <defaults>
</compile_context>

<pallas_src>
import jax
import jax.numpy as jnp
from jax.experimental import pallas as pl
from jax.experimental.pallas import tpu as pltpu

_LANE = 128      # lanes per vreg
_SUBLANE = 8     # f32 sublanes per vreg


def _round_up(v, m):
    return (v + m - 1) // m * m


def _full_vmem_spec(shape):
    # Whole-array block resident in VMEM (block == full array dims).
    return pl.BlockSpec(shape, lambda: tuple(0 for _ in shape),
                        memory_space=pltpu.VMEM)


# ----------------------------- Fused kernel --------------------------------

def _make_fused_kernel(num_layers, hidden_size):
    """Kernel refs: (x, w_l0, b_l0, ..., w_l{L-1}, b_l{L-1}, w_fc, b_fc, out)."""
    H2 = 2 * hidden_size
    H4 = 4 * hidden_size
    H8 = 8 * hidden_size

    def kernel(*refs):
        x_ref = refs[0]
        out_ref = refs[-1]

        h = x_ref[...]                                  # (B_pad, D_in)
        for l in range(num_layers):
            w = refs[1 + 2 * l][...]                    # (D_in, 8H) packed
            b = refs[2 + 2 * l][...]                    # (1, 8H)
            gates = jnp.dot(h, w, preferred_element_type=jnp.float32) + b
            # Contiguous, vreg-aligned activation slabs:
            #   lanes [0, 4H)  : [i_fwd | i_bwd | o_fwd | o_bwd]  -> sigmoid
            #   lanes [4H, 8H) : [g_fwd | g_bwd | zero-pad]       -> tanh
            sig = jax.nn.sigmoid(gates[:, :H4])
            tnh = jnp.tanh(gates[:, H4:H8])
            i = sig[:, :H2]                             # [i_fwd | i_bwd]
            o = sig[:, H2:H4]                           # [o_fwd | o_bwd]
            g = tnh[:, :H2]                             # [g_fwd | g_bwd]
            # c0 == 0 => c = i*g ; h = o * tanh(c); layout stays [h_fwd|h_bwd]
            h = o * jnp.tanh(i * g)                     # (B_pad, 2H)

        w_fc = refs[-3][...]                            # (2H, C_pad)
        b_fc = refs[-2][...]                            # (1, C_pad)
        out_ref[...] = (jnp.dot(h, w_fc, preferred_element_type=jnp.float32)
                        + b_fc).astype(out_ref.dtype)

    return kernel


# ------------------------------ Wrappers ------------------------------------

def bilstm_classifier2_forward(x, params, *, hidden_size, num_layers,
                               num_classes):
    """x: (B, input_size) float32 -> (B, num_classes) float32."""
    B = x.shape[0]
    B_pad = _round_up(max(B, _SUBLANE), _SUBLANE)
    x_pad = jnp.zeros((B_pad, x.shape[1]), x.dtype).at[:B].set(x)
    C_pad = params["fc_w"].shape[1]

    inputs = [x_pad]
    for l in range(num_layers):
        inputs += [params[f"w_l{l}"], params[f"b_l{l}"]]
    inputs += [params["fc_w"], params["fc_b"]]

    out = pl.pallas_call(
        _make_fused_kernel(num_layers, hidden_size),
        out_shape=jax.ShapeDtypeStruct((B_pad, C_pad), jnp.float32),
        in_specs=[_full_vmem_spec(a.shape) for a in inputs],
        out_specs=_full_vmem_spec((B_pad, C_pad)),
    )(*inputs)
    return out[:B, :num_classes]


def init_params(key, input_size, hidden_size, num_layers, num_classes):
    """Synthetic params mirroring torch.nn.LSTM/Linear, repacked for the kernel.

    Per layer & direction torch has W_ih:(4H,D_in), b_ih:(4H), b_hh:(4H) with
    gate order (i, f, g, o).  The f gate and W_hh never contribute (c0=h0=0,
    seq_len=1), so they are dropped.  Both directions are packed into one
    (D_in, 8H) weight with column order [i_f|i_b|o_f|o_b|g_f|g_b|zeros(2H)]
    (zero pad keeps the width a multiple of 128 for H=32); the two biases are
    summed and packed identically.
    """
    H = hidden_size
    params = {}
    bound = 1.0 / jnp.sqrt(H)
    for l in range(num_layers):
        d_in = input_size if l == 0 else 2 * H
        w_g = {}
        b_g = {}
        for direction in ("fwd", "bwd"):
            key, k1, k2, k3 = jax.random.split(key, 4)
            w_ih = jax.random.uniform(k1, (4 * H, d_in), minval=-bound,
                                      maxval=bound, dtype=jnp.float32)
            b_ih = jax.random.uniform(k2, (4 * H,), minval=-bound,
                                      maxval=bound, dtype=jnp.float32)
            b_hh = jax.random.uniform(k3, (4 * H,), minval=-bound,
                                      maxval=bound, dtype=jnp.float32)
            b = b_ih + b_hh
            # torch gate row order: i, f, g, o  (f dropped).
            w_g[direction] = {"i": w_ih[0 * H:1 * H],
                              "g": w_ih[2 * H:3 * H],
                              "o": w_ih[3 * H:4 * H]}
            b_g[direction] = {"i": b[0 * H:1 * H],
                              "g": b[2 * H:3 * H],
                              "o": b[3 * H:4 * H]}
        w_pack = jnp.concatenate(
            [w_g["fwd"]["i"], w_g["bwd"]["i"],
             w_g["fwd"]["o"], w_g["bwd"]["o"],
             w_g["fwd"]["g"], w_g["bwd"]["g"],
             jnp.zeros((2 * H, d_in), jnp.float32)], axis=0).T   # (D_in, 8H)
        b_pack = jnp.concatenate(
            [b_g["fwd"]["i"], b_g["bwd"]["i"],
             b_g["fwd"]["o"], b_g["bwd"]["o"],
             b_g["fwd"]["g"], b_g["bwd"]["g"],
             jnp.zeros((2 * H,), jnp.float32)])[None, :]         # (1, 8H)
        params[f"w_l{l}"] = w_pack
        params[f"b_l{l}"] = b_pack

    key, k1, k2 = jax.random.split(key, 3)
    fc_bound = 1.0 / jnp.sqrt(2 * H)
    w_fc = jax.random.uniform(k1, (num_classes, 2 * H), minval=-fc_bound,
                              maxval=fc_bound, dtype=jnp.float32)
    b_fc = jax.random.uniform(k2, (num_classes,), minval=-fc_bound,
                              maxval=fc_bound, dtype=jnp.float32)
    c_pad = _round_up(num_classes, _LANE)   # lane-dense final store
    params["fc_w"] = jnp.zeros((2 * H, c_pad),
                               jnp.float32).at[:, :num_classes].set(w_fc.T)
    params["fc_b"] = jnp.zeros((1, c_pad),
                               jnp.float32).at[:, :num_classes].set(b_fc)
    return params


def _reference_forward(x, params, hidden_size, num_layers, num_classes):
    """Pure-JAX reference using the same packed params (validates plumbing)."""
    H2, H4, H8 = 2 * hidden_size, 4 * hidden_size, 8 * hidden_size
    h = x
    for l in range(num_layers):
        gates = h @ params[f"w_l{l}"] + params[f"b_l{l}"]
        sig = jax.nn.sigmoid(gates[:, :H4])
        tnh = jnp.tanh(gates[:, H4:H8])
        h = sig[:, H2:H4] * jnp.tanh(sig[:, :H2] * tnh[:, :H2])
    out = h @ params["fc_w"] + params["fc_b"]
    return out[:, :num_classes]


# ------------------------------- Main ---------------------------------------

if __name__ == "__main__":
    batch = 2
    input_size = 16
    hidden_size = 32
    num_layers = 2
    num_classes = 4

    key = jax.random.PRNGKey(0)
    key, xk = jax.random.split(key)
    x = jax.random.normal(xk, (batch, input_size), dtype=jnp.float32)

    params = init_params(key, input_size, hidden_size, num_layers, num_classes)

    fwd = jax.jit(bilstm_classifier2_forward,
                  static_argnames=("hidden_size", "num_layers", "num_classes"))
    out = fwd(x, params, hidden_size=hidden_size, num_layers=num_layers,
              num_classes=num_classes)
    out = jax.block_until_ready(out)

    assert out.shape == (batch, num_classes), out.shape
    assert out.dtype == jnp.float32

    ref = _reference_forward(x, params, hidden_size, num_layers, num_classes)
    assert jnp.allclose(out, ref, atol=1e-5, rtol=1e-5), (out, ref)

    print("KERNEL_OK")
</pallas_src>

<mosaic_0001>
module attributes {stable_mosaic.version = 11 : i64} {
  func.func @kernel(%arg0: memref<8x16xf32, #tpu.memory_space<vmem>>, %arg1: memref<16x256xf32, #tpu.memory_space<vmem>>, %arg2: memref<1x256xf32, #tpu.memory_space<vmem>>, %arg3: memref<64x256xf32, #tpu.memory_space<vmem>>, %arg4: memref<1x256xf32, #tpu.memory_space<vmem>>, %arg5: memref<64x128xf32, #tpu.memory_space<vmem>>, %arg6: memref<1x128xf32, #tpu.memory_space<vmem>>, %arg7: memref<8x128xf32, #tpu.memory_space<vmem>>) attributes {dimension_semantics = [], scalar_prefetch = 0 : i64, scratch_operands = 0 : i64, tpu.core_type = #tpu.core_type<tc>} {
    %c0 = arith.constant 0 : index
    %c0_0 = arith.constant 0 : index
    %0 = vector.load %arg0[%c0, %c0_0] : memref<8x16xf32, #tpu.memory_space<vmem>>, vector<8x16xf32>
    %c0_1 = arith.constant 0 : index
    %c0_2 = arith.constant 0 : index
    %1 = vector.load %arg1[%c0_1, %c0_2] : memref<16x256xf32, #tpu.memory_space<vmem>>, vector<16x256xf32>
    %c0_3 = arith.constant 0 : index
    %c0_4 = arith.constant 0 : index
    %2 = vector.load %arg2[%c0_3, %c0_4] : memref<1x256xf32, #tpu.memory_space<vmem>>, vector<1x256xf32>
    %cst = arith.constant dense<0.000000e+00> : vector<8x256xf32>
    %3 = tpu.matmul %0, %1, %cst {dimension_numbers = #tpu.dot_dimension_numbers<[1], [0], [0], [1], [0, 0, 1, 1], [], []>} : vector<8x16xf32>, vector<16x256xf32>, vector<8x256xf32> -> vector<8x256xf32>
    %4 = vector.broadcast %2 : vector<1x256xf32> to vector<8x256xf32>
    %5 = arith.addf %3, %4 : vector<8x256xf32>
    %6 = vector.extract_strided_slice %5 {offsets = [0, 0], sizes = [8, 128], strides = [1, 1]} : vector<8x256xf32> to vector<8x128xf32>
    %7 = arith.negf %6 : vector<8x128xf32>
    %8 = math.exp %7 : vector<8x128xf32>
    %cst_5 = arith.constant 1.000000e+00 : f32
    %9 = vector.broadcast %cst_5 : f32 to vector<8x128xf32>
    %10 = arith.addf %9, %8 : vector<8x128xf32>
    %11 = arith.divf %9, %10 : vector<8x128xf32>
    %12 = vector.extract_strided_slice %5 {offsets = [0, 128], sizes = [8, 128], strides = [1, 1]} : vector<8x256xf32> to vector<8x128xf32>
    %13 = math.tanh %12 : vector<8x128xf32>
    %14 = vector.extract_strided_slice %11 {offsets = [0, 0], sizes = [8, 64], strides = [1, 1]} : vector<8x128xf32> to vector<8x64xf32>
    %15 = vector.extract_strided_slice %11 {offsets = [0, 64], sizes = [8, 64], strides = [1, 1]} : vector<8x128xf32> to vector<8x64xf32>
    %16 = vector.extract_strided_slice %13 {offsets = [0, 0], sizes = [8, 64], strides = [1, 1]} : vector<8x128xf32> to vector<8x64xf32>
    %17 = arith.mulf %14, %16 : vector<8x64xf32>
    %18 = math.tanh %17 : vector<8x64xf32>
    %19 = arith.mulf %15, %18 : vector<8x64xf32>
    %c0_6 = arith.constant 0 : index
    %c0_7 = arith.constant 0 : index
    %20 = vector.load %arg3[%c0_6, %c0_7] : memref<64x256xf32, #tpu.memory_space<vmem>>, vector<64x256xf32>
    %c0_8 = arith.constant 0 : index
    %c0_9 = arith.constant 0 : index
    %21 = vector.load %arg4[%c0_8, %c0_9] : memref<1x256xf32, #tpu.memory_space<vmem>>, vector<1x256xf32>
    %cst_10 = arith.constant dense<0.000000e+00> : vector<8x256xf32>
    %22 = tpu.matmul %19, %20, %cst_10 {dimension_numbers = #tpu.dot_dimension_numbers<[1], [0], [0], [1], [0, 0, 1, 1], [], []>} : vector<8x64xf32>, vector<64x256xf32>, vector<8x256xf32> -> vector<8x256xf32>
    %23 = vector.broadcast %21 : vector<1x256xf32> to vector<8x256xf32>
    %24 = arith.addf %22, %23 : vector<8x256xf32>
    %25 = vector.extract_strided_slice %24 {offsets = [0, 0], sizes = [8, 128], strides = [1, 1]} : vector<8x256xf32> to vector<8x128xf32>
    %26 = arith.negf %25 : vector<8x128xf32>
    %27 = math.exp %26 : vector<8x128xf32>
    %cst_11 = arith.constant 1.000000e+00 : f32
    %28 = vector.broadcast %cst_11 : f32 to vector<8x128xf32>
    %29 = arith.addf %28, %27 : vector<8x128xf32>
    %30 = arith.divf %28, %29 : vector<8x128xf32>
    %31 = vector.extract_strided_slice %24 {offsets = [0, 128], sizes = [8, 128], strides = [1, 1]} : vector<8x256xf32> to vector<8x128xf32>
    %32 = math.tanh %31 : vector<8x128xf32>
    %33 = vector.extract_strided_slice %30 {offsets = [0, 0], sizes = [8, 64], strides = [1, 1]} : vector<8x128xf32> to vector<8x64xf32>
    %34 = vector.extract_strided_slice %30 {offsets = [0, 64], sizes = [8, 64], strides = [1, 1]} : vector<8x128xf32> to vector<8x64xf32>
    %35 = vector.extract_strided_slice %32 {offsets = [0, 0], sizes = [8, 64], strides = [1, 1]} : vector<8x128xf32> to vector<8x64xf32>
    %36 = arith.mulf %33, %35 : vector<8x64xf32>
    %37 = math.tanh %36 : vector<8x64xf32>
    %38 = arith.mulf %34, %37 : vector<8x64xf32>
    %c0_12 = arith.constant 0 : index
    %c0_13 = arith.constant 0 : index
    %39 = vector.load %arg5[%c0_12, %c0_13] : memref<64x128xf32, #tpu.memory_space<vmem>>, vector<64x128xf32>
    %c0_14 = arith.constant 0 : index
    %c0_15 = arith.constant 0 : index
    %40 = vector.load %arg6[%c0_14, %c0_15] : memref<1x128xf32, #tpu.memory_space<vmem>>, vector<1x128xf32>
    %cst_16 = arith.constant dense<0.000000e+00> : vector<8x128xf32>
    %41 = tpu.matmul %38, %39, %cst_16 {dimension_numbers = #tpu.dot_dimension_numbers<[1], [0], [0], [1], [0, 0, 1, 1], [], []>} : vector<8x64xf32>, vector<64x128xf32>, vector<8x128xf32> -> vector<8x128xf32>
    %42 = vector.broadcast %40 : vector<1x128xf32> to vector<8x128xf32>
    %43 = arith.addf %41, %42 : vector<8x128xf32>
    %c0_17 = arith.constant 0 : index
    %c0_18 = arith.constant 0 : index
    %44 = vector.load %arg7[%c0_17, %c0_18] : memref<8x128xf32, #tpu.memory_space<vmem>>, vector<8x128xf32>
    tpu.vector_store %arg7[%c0_17, %c0_18], %43 {strides = array<i32>} : memref<8x128xf32, #tpu.memory_space<vmem>>, vector<8x128xf32>,
    return
  }
}

</mosaic_0001>

<bundles_post_ra>
// kernel: bilstm_classifier2_forward.1
= control target key start
LH: loop header
LB: loop body
LE: loop exit
PB: predicated region body
PF: predicated region fallthrough
CT: control target
= control target key end

     0   :  { %12 = vsyncpa [#allocation3], 0  ;;  %s608_s0 = inlined_call_operand.vmem [shape: f32[8,16], index: 0, kind: input, shape index: {}]   ;;  %s609_s1 = inlined_call_operand.hbm [shape: f32[16,256], index: 1, kind: input, shape index: {}]   ;;  %s610_s2 = inlined_call_operand.vmem [shape: f32[1,256], index: 2, kind: input, shape index: {}]   ;;  %s611_s3 = inlined_call_operand.hbm [shape: f32[64,256], index: 3, kind: input, shape index: {}]   ;;  %s612_s4 = inlined_call_operand.vmem [shape: f32[1,256], index: 4, kind: input, shape index: {}]   ;;  %s613_s5 = inlined_call_operand.hbm [shape: f32[64,128], index: 5, kind: input, shape index: {}]   ;;  %s614_s6 = inlined_call_operand.vmem [shape: f32[1,128], index: 6, kind: input, shape index: {}]   ;;  %s615_s7 = inlined_call_operand.vmem [shape: f32[8,128], index: 7, kind: output, shape index: {}]  }
   0x1   :  { %13 = vsyncpa [#allocation5], 0  ;;  %s513_s24 = smov [#allocation4]   ;;  %s514_s26 = smov [#allocation2]  }
   0x2   :  { %s35_s25 = sshll.u32 %s513_s24, 4  ;;  %s21_s27 = sshll.u32 %s514_s26, 4  ;;  %s36_s25 = int_to_ptr.vmem [resolvable:$true] %s35_s25  ;;  %s22_s27 = int_to_ptr.vmem [resolvable:$true] %s21_s27 }
   0x3   :  { %s457_s28 = scalar_lea.vmem %s36_s25, 2048  ;;  %p462_p1 = scmp.lt.s32.totalorder %s36_s25, %s36_s25 }
   0x4   :  { %p458_p0 = scmp.ne.s32.totalorder %s36_s25, %s457_s28  ;;  %p463_p2 = scmp.lt.s32.totalorder %s457_s28, %s457_s28 }
   0x6   :  { %p464_p3 = por %p463_p2, %p462_p1 }
   0x8   :  { %p465_p4 = pnand %p464_p3, %p458_p0 }
   0xa   :  { %468 = shalt.err (!%p465_p4)
}
   0xb   :  { %s515_s29 = smov 256   ;;  %s516_s30 = smov 16  }
   0xc   :  { %41 = dma.hbm_to_vmem [thread:$0]  %s611_s3, 2048, %s36_s25, [#allocation5], %s515_s29, %s515_s29, %s516_s30  }
   0xd   :  { %s477_s10 = scalar_lea.vmem %s22_s27, 512  ;;  %p482_p6 = scmp.lt.s32.totalorder %s22_s27, %s22_s27 }
   0xe   :  { %p478_p5 = scmp.ne.s32.totalorder %s22_s27, %s477_s10  ;;  %p483_p7 = scmp.lt.s32.totalorder %s477_s10, %s477_s10 }
  0x10   :  { %p484_p8 = por %p483_p7, %p482_p6 }
  0x12   :  { %p485_p9 = pnand %p484_p8, %p478_p5 }
  0x14   :  { %488 = shalt.err (!%p485_p9)
}
  0x15   :  { %27 = dma.hbm_to_vmem [thread:$0]  %s609_s1, 512, %s22_s27, [#allocation3], %s515_s29, %s515_s29, %s516_s30  }
  0x16   :  { %s517_s13 = smov [#allocation6]  }
  0x17   :  { %s49_s14 = sshll.u32 %s517_s13, 4  ;;  %s50_s14 = int_to_ptr.vmem [resolvable:$true] %s49_s14 }
  0x18   :  { %s497_s15 = scalar_lea.vmem %s50_s14, 1024  ;;  %p502_p11 = scmp.lt.s32.totalorder %s50_s14, %s50_s14 }
  0x19   :  { %p498_p10 = scmp.ne.s32.totalorder %s50_s14, %s497_s15  ;;  %p503_p12 = scmp.lt.s32.totalorder %s497_s15, %s497_s15 }
  0x1b   :  { %p504_p13 = por %p503_p12, %p502_p11 }
  0x1d   :  { %p505_p0 = pnand %p504_p13, %p498_p10 }
  0x1f   :  { %508 = shalt.err (!%p505_p0)
}
  0x20   :  { %s518_s3 = smov 128   ;;  %s519_s16 = smov 8  }
  0x21   :  { %55 = dma.hbm_to_vmem [thread:$0]  %s613_s5, 1024, %s50_s14, [#allocation5], %s518_s3, %s518_s3, %s519_s16  }
  0x22   :  { %509 = dma.done.wait [#allocation3], 512  }
  0x23   :  { %510 = vsyncadd [#allocation3], 4294966784 }
  0x24   :  { %511 = dma.done.wait [#allocation5], 3072  }
  0x25   :  { %512 = vsyncadd [#allocation5], 4294964224  ;;  %v520_v0 = vmov 0.0   ;;  %v71_v1 = vld [vmem:[#allocation2 + $0x18] sm:$0xff]  ;;  %v70_v2 = vld [vmem:[#allocation2 + $0x10] sm:$0xff]  ;;  %vm84_vm0 = vcmask 130048   ;;  %v74_v6 = vlaneseq }
  0x26   :  { %152 = vmatprep.mubr.f32.mxu0 %v520_v0  ;;  %271 = vmatprep.mubr.f32.mxu1 %v520_v0  ;;  %v69_v3 = vld [vmem:[#allocation2 + $0x8] sm:$0xff]  ;;  %v68_v4 = vld [vmem:[#allocation2] sm:$0xff]  ;;  %v188_v23 = vld [vmem:[#allocation4 + $0x78] sm:$0xff]  ;;  %vm204_vm1 = vcmask 523264   ;;  %vm522_vm2 = vmmov 0  }
  0x27   :  { %116 = vmatprep.subr.mxu0 %v71_v1  ;;  %v67_v5 = vld [vmem:[%s608_s0] sm:$0xff]  ;;  %v578_v7 = vshrl.u32 %v74_v6, 7  ;;  %v187_v24 = vld [vmem:[#allocation4 + $0x70] sm:$0xff]  ;;  %v186_v25 = vld [vmem:[#allocation4 + $0x68] sm:$0xff]  ;;  %223 = vmatprep.subr.mxu1 %v188_v23  ;;  %s521_s0 = smov 64  }
  0x28   :  { %117 = vmatpush1.msra.mxu0 %v70_v2  ;;  %v72_v9 = vld [vmem:[%s610_s2] sm:$0x3]  ;;  %224 = vmatpush1.msra.mxu1 %v187_v24  ;;  %v184_v27 = vld [vmem:[#allocation4 + $0x58] sm:$0xff]  ;;  %v183_v28 = vld [vmem:[#allocation4 + $0x50] sm:$0xff] }
  0x29   :  { %118 = vmatprep.subr.mxu0 %v69_v3  ;;  %v76_v8 = vsub.s32 0, %v578_v7  ;;  %v80_v14 = vsub.s32 1, %v578_v7  ;;  %v185_v26 = vld [vmem:[#allocation4 + $0x60] sm:$0xff]  ;;  %225 = vmatprep.subr.mxu1 %v186_v25  ;;  %v182_v29 = vld [vmem:[#allocation4 + $0x48] sm:$0xff]  ;;  %v180_v31 = vld [vmem:[#allocation4 + $0x38] sm:$0xff] }
  0x2a   :  { %119 = vmatpush1.msra.mxu0 %v68_v4  ;;  %226 = vmatpush1.msra.mxu1 %v185_v26  ;;  %v181_v30 = vld [vmem:[#allocation4 + $0x40] sm:$0xff]  ;;  %v179_v32 = vld [vmem:[#allocation4 + $0x30] sm:$0xff]  ;;  %v178_v33 = vld [vmem:[#allocation4 + $0x28] sm:$0xff] }
  0x2b   :  { %389 = vmatmul.mubr.msk.f32.vlgmr.msra.gmra.mxu0 %vm84_vm0, %v67_v5  ;;  %404 = vmatprep.subr.mxu0 %v520_v0  ;;  %v77_v10 = vrot.slane %v72_v9, %v76_v8  ;;  %v81_v15 = vrot.slane %v72_v9, %v80_v14  ;;  %v177_v34 = vld [vmem:[#allocation4 + $0x20] sm:$0xff]  ;;  %v176_v36 = vld [vmem:[#allocation4 + $0x18] sm:$0xff]  ;;  %v175_v37 = vld [vmem:[#allocation4 + $0x10] sm:$0xff] }
  0x2c   :  { %227 = vmatprep.subr.mxu1 %v184_v27  ;;  %v174_v38 = vld [vmem:[#allocation4 + $0x8] sm:$0xff]  ;;  %v173_v39 = vld [vmem:[#allocation4] sm:$0xff]  ;;  %v299_v56 = vld [vmem:[#allocation6 + $0x38] sm:$0xff]  ;;  %420 = vmatprep.mubr.msk.f32.mxu0 %vm522_vm2, %v520_v0 }
  0x2d   :  { %228 = vmatpush1.msra.mxu1 %v183_v28  ;;  %v189_v43 = vld [vmem:[%s612_s4] sm:$0x3]  ;;  %v298_v57 = vld [vmem:[#allocation6 + $0x30] sm:$0xff]  ;;  %405 = vmatpush3.msra.mxu0 %v299_v56  ;;  %v297_v58 = vld [vmem:[#allocation6 + $0x28] sm:$0xff] }
  0x2e   :  { %229 = vmatprep.subr.mxu1 %v182_v29  ;;  %v194_v44 = vrot.slane %v189_v43, %v76_v8  ;;  %v198_v48 = vrot.slane %v189_v43, %v80_v14  ;;  %406 = vmatprep.subr.mxu0 %v520_v0  ;;  %v296_v59 = vld [vmem:[#allocation6 + $0x20] sm:$0xff]  ;;  %v295_v60 = vld [vmem:[#allocation6 + $0x18] sm:$0xff]  ;;  %v294_v61 = vld [vmem:[#allocation6 + $0x10] sm:$0xff] }
  0x2f   :  { %230 = vmatpush1.msra.mxu1 %v181_v30  ;;  %407 = vmatpush3.msra.mxu0 %v298_v57  ;;  %v293_v63 = vld [vmem:[#allocation6 + $0x8] sm:$0xff]  ;;  %v292_v1 = vld [vmem:[#allocation6] sm:$0xff] }
  0x30   :  { %231 = vmatprep.subr.mxu1 %v180_v31  ;;  %408 = vmatprep.subr.mxu0 %v520_v0  ;;  %v393_v5 = vld [vmem:[%s614_s6] ss:$0 sm:$0xff] }
  0x31   :  { %232 = vmatpush1.msra.mxu1 %v179_v32  ;;  %409 = vmatpush3.msra.mxu0 %v297_v58 }
  0x32   :  { %233 = vmatprep.subr.mxu1 %v178_v33  ;;  %410 = vmatprep.subr.mxu0 %v520_v0 }
  0x33   :  { %234 = vmatpush1.msra.mxu1 %v177_v34  ;;  %411 = vmatpush3.msra.mxu0 %v296_v59 }
  0x34   :  { %235 = vmatprep.subr.mxu1 %v176_v36  ;;  %412 = vmatprep.subr.mxu0 %v520_v0 }
  0x35   :  { %236 = vmatpush1.msra.mxu1 %v175_v37  ;;  %413 = vmatpush3.msra.mxu0 %v295_v60 }
  0x36   :  { %237 = vmatprep.subr.mxu1 %v174_v38  ;;  %414 = vmatprep.subr.mxu0 %v520_v0 }
  0x37   :  { %238 = vmatpush1.msra.mxu1 %v173_v39  ;;  %415 = vmatpush3.msra.mxu0 %v294_v61 }
  0x38   :  { %416 = vmatprep.subr.mxu0 %v520_v0 }
  0x39   :  { %417 = vmatpush3.msra.mxu0 %v293_v63 }
  0x3a   :  { %418 = vmatprep.subr.mxu0 %v520_v0 }
  0x3b   :  { %419 = vmatpush3.msra.mxu0 %v292_v1 }
  0xeb   :  { %v154_v11 = vpop.f32.mrf.mxu0 }
  0xec   :  { %v155_v12 = vadd.f32 %v154_v11, %v77_v10 }
  0xed   :  { %v156_v16 = vpop.f32.mrf.mxu0 }
  0xee   :  { %v390_v13 = vmul.f32 -1.442695, %v155_v12  ;;  %v157_v17 = vadd.f32 %v156_v16, %v81_v15 }
  0xf0   :  { %433 = vpow2.f32 %v390_v13 }
  0xf1   :  { %435 = vtanh.f32 %v157_v17 }
  0xfd   :  { %v434_v18 = vpop.eup %433 }
  0xfe   :  { %v162_v19 = vadd.f32 1.0, %v434_v18  ;;  %v436_v20 = vpop.eup %435 }
 0x100   :  { %437 = vrcp.f32 %v162_v19 }
 0x10d   :  { %v438_v21 = vpop.eup %437 }
 0x10e   :  { %v166_v22 = vmul.f32 %v438_v21, %v436_v20 }
 0x110   :  { %439 = vtanh.f32 %v166_v22 }
 0x11d   :  { %v440_v35 = vpop.eup %439 }
 0x11e   :  { %169 = vrot.lane.b32.xlu0 %v440_v35, %s521_s0 }
 0x190   :  { %v170_v40 = vpop.permute.xlu0 %169 }
 0x191   :  { %v172_v41 = vmul.f32 %v438_v21, %v170_v40 }
 0x193   :  { %202 = vrot.lane.b32.xlu0 %v172_v41, %s521_s0 }
 0x205   :  { %v203_v42 = vpop.permute.xlu0 %202 }
 0x206   :  { %391 = vmatmul.mubr.msk.f32.vlgmr.msra.gmra.mxu1 %vm204_vm1, %v203_v42 }
 0x2c6   :  { %v273_v45 = vpop.f32.mrf.mxu1 }
 0x2c7   :  { %v274_v46 = vadd.f32 %v273_v45, %v194_v44 }
 0x2c8   :  { %v275_v49 = vpop.f32.mrf.mxu1 }
 0x2c9   :  { %v392_v47 = vmul.f32 -1.442695, %v274_v46  ;;  %v276_v50 = vadd.f32 %v275_v49, %v198_v48 }
 0x2cb   :  { %441 = vpow2.f32 %v392_v47 }
 0x2cc   :  { %443 = vtanh.f32 %v276_v50 }
 0x2d8   :  { %v442_v51 = vpop.eup %441 }
 0x2d9   :  { %v281_v52 = vadd.f32 1.0, %v442_v51  ;;  %v444_v53 = vpop.eup %443 }
 0x2db   :  { %445 = vrcp.f32 %v281_v52 }
 0x2e8   :  { %v446_v54 = vpop.eup %445 }
 0x2e9   :  { %v285_v55 = vmul.f32 %v446_v54, %v444_v53 }
 0x2eb   :  { %447 = vtanh.f32 %v285_v55 }
 0x2f8   :  { %v448_v62 = vpop.eup %447 }
 0x2f9   :  { %288 = vrot.lane.b32.xlu1 %v448_v62, %s521_s0 }
 0x36b   :  { %v289_v2 = vpop.permute.xlu1 %288 }
 0x36c   :  { %v291_v3 = vmul.f32 %v446_v54, %v289_v2 }
 0x36e   :  { %308 = vrot.lane.b32.xlu1 %v291_v3, %s521_s0 }
 0x3e0   :  { %v309_v4 = vpop.permute.xlu1 %308 }
 0x3e1   :  { %421 = vmatmul.mubr.msk.f32.vlgmr.msra.gmra.mxu0 %vm204_vm1, %v309_v4 }
 0x4a1   :  { %v378_v6 = vpop.f32.mrf.mxu0 }
 0x4a2   :  { %v379_v7 = vadd.f32 %v393_v5, %v378_v6 }
 0x4a3   :  { %v422_v8 = vpop.f32.mrf.mxu0 }
 0x4a4   :  { %382 = vst [vmem:[%s615_s7] sm:$0xff] %v379_v7 }
 0x4a5   :  { %387 = vsyncpa [#allocation3], 1 }
 0x4a6   :  { %388 = vsyncpa [#allocation5], 1 }

</bundles_post_ra>
